<compile_context>
chip_gen: v7x
topology: tpu7x:2x2x1
jax: 0.10.0
libtpu: 0.0.40
codegen_flags: <defaults>
</compile_context>

<pallas_src>
import functools

import jax
import jax.numpy as jnp
from jax.experimental import pallas as pl
from jax.experimental.pallas import tpu as pltpu


def _gtc_kernel(m_ref, x_ref, o_ref, *, kernel_length, pad_l):
    nb, t_len, cv = x_ref.shape          # (batch block, T, C_in*V)
    out_lanes = o_ref.shape[-1]          # C_out*V

    xt = x_ref[...]                      # (nb, T, C_in*V) f32

    # Build the K temporally-shifted copies (zero padded 'same' halo).  All shifts
    # are static slices + sublane concats with zeros; no masks needed because the
    # shift happens along the true time axis before any flattening.
    taps = []
    for k in range(kernel_length):
        s = k - pad_l                                    # source offset along t
        if abs(s) >= t_len:                              # tap entirely out of range
            taps.append(jnp.zeros((nb, t_len, cv), xt.dtype))
        elif s == 0:
            taps.append(xt)
        elif s < 0:
            z = jnp.zeros((nb, -s, cv), xt.dtype)
            taps.append(jnp.concatenate([z, xt[:, : t_len + s, :]], axis=1))
        else:
            z = jnp.zeros((nb, s, cv), xt.dtype)
            taps.append(jnp.concatenate([xt[:, s:, :], z], axis=1))

    # Lane-concat the taps: xs[b, t, k*CV + c*V + u] = x[b, c, u, t + k - pad_l].
    xs = taps[0] if kernel_length == 1 else jnp.concatenate(taps, axis=2)

    # One MXU matmul does graph aggregation + temporal conv + channel mixing.
    # (nb*T, K*C_in*V) @ (K*C_in*V, C_out*V) -> (nb*T, C_out*V), f32 accumulation.
    xs2 = xs.reshape(nb * t_len, kernel_length * cv)
    out = jnp.dot(xs2, m_ref[...], preferred_element_type=jnp.float32)

    o_ref[...] = out.reshape(nb, t_len, out_lanes).astype(o_ref.dtype)


def graph_temporal_conv(x, adjacency, importance, conv_weight):
    n_batch, c_in, v_nodes, t_len = x.shape
    c_out, c_in2, one, k_len = conv_weight.shape
    assert c_in == c_in2 and one == 1
    cv = c_in * v_nodes
    out_lanes = c_out * v_nodes

    # PyTorch Conv2d(padding='same', stride=1): left pad = (K-1)//2, right = rest.
    pad_l = (k_len - 1) // 2

    # ---- Parameter-only folding (batch independent, done once per forward) ----
    # a_eff[c,v,u] = adjacency[v,u] * importance[c,v,u]
    a_eff = (adjacency[None, :, :] * importance).astype(jnp.float32)      # (C_in,V,V)
    w = conv_weight[:, :, 0, :].astype(jnp.float32)                       # (C_out,C_in,K)
    # M[(k,c,u),(o,v)] = w[o,c,k] * a_eff[c,v,u]
    m = jnp.einsum('ock,cvu->kcuov', w, a_eff).reshape(k_len * cv, out_lanes)

    # ---- Layout plumbing: present x lane-dense as (N, T, C_in*V) ----
    xt = x.astype(jnp.float32).reshape(n_batch, cv, t_len).transpose(0, 2, 1)

    # ---- Batch block: amortize per-grid-step overhead (needs T % 8 == 0 so the
    # in-kernel (nb, T, .) -> (nb*T, .) collapse is a layout no-op). ----
    if t_len % 8 == 0:
        max_rows = 256
        nb = 1
        for d in range(1, n_batch + 1):
            if n_batch % d == 0 and d * t_len <= max_rows:
                nb = d
    else:
        nb = 1
    grid = (n_batch // nb,)

    kernel = functools.partial(_gtc_kernel, kernel_length=k_len, pad_l=pad_l)

    grid_spec = pltpu.PrefetchScalarGridSpec(
        num_scalar_prefetch=0,
        grid=grid,
        in_specs=[
            # Fused parameter matrix: same block every step (kept resident).
            pl.BlockSpec((k_len * cv, out_lanes), lambda b: (0, 0)),
            # nb batch elements per step, lane-dense in C_in*V.
            pl.BlockSpec((nb, t_len, cv), lambda b: (b, 0, 0)),
        ],
        out_specs=pl.BlockSpec((nb, t_len, out_lanes), lambda b: (b, 0, 0)),
    )

    out_t = pl.pallas_call(
        kernel,
        grid_spec=grid_spec,
        out_shape=jax.ShapeDtypeStruct((n_batch, t_len, out_lanes), x.dtype),
        compiler_params=pltpu.CompilerParams(
            dimension_semantics=("parallel",)),
    )(m, xt)

    # Lane-dense (N, T, C_out*V) slab back to the module's (N, C_out, V, T) layout.
    return out_t.reshape(n_batch, t_len, c_out, v_nodes).transpose(0, 2, 3, 1)


def reference(x, adjacency, importance, conv_weight):
    """Pure-JAX reference matching the PyTorch forward."""
    N, c_in, V, T = x.shape
    c_out = conv_weight.shape[0]
    K = conv_weight.shape[-1]
    a_eff = adjacency[None] * importance                        # (C_in, V, V)
    y = jnp.einsum('cvu,ncut->ncvt', a_eff, x)                   # (N, C_in, V, T)
    pad_l = (K - 1) // 2
    pad_r = (K - 1) - pad_l
    y_pad = jnp.pad(y, ((0, 0), (0, 0), (0, 0), (pad_l, pad_r)))
    w = conv_weight[:, :, 0, :]                                  # (C_out, C_in, K)
    out = jnp.zeros((N, c_out, V, T), x.dtype)
    for k in range(K):
        out = out + jnp.einsum('oc,ncvt->novt', w[:, :, k], y_pad[..., k:k + T])
    return out


if __name__ == "__main__":
    N, C_IN, C_OUT, V, T, K = 2, 4, 8, 16, 16, 3

    key = jax.random.PRNGKey(0)
    k1, k2, k3, k4 = jax.random.split(key, 4)
    x = jax.random.normal(k1, (N, C_IN, V, T), dtype=jnp.float32)
    adjacency = jax.random.normal(k2, (V, V), dtype=jnp.float32)
    importance = jax.random.normal(k3, (C_IN, V, V), dtype=jnp.float32)   # randn init
    conv_weight = 0.1 * jax.random.normal(k4, (C_OUT, C_IN, 1, K), dtype=jnp.float32)

    out = graph_temporal_conv(x, adjacency, importance, conv_weight)
    out = jax.block_until_ready(out)

    ref = reference(x, adjacency, importance, conv_weight)
    assert out.shape == (N, C_OUT, V, T)
    assert jnp.allclose(out, ref, atol=1e-4, rtol=1e-4), \
        f"max abs err = {float(jnp.max(jnp.abs(out - ref)))}"

    print("KERNEL_OK")
</pallas_src>

<mosaic_0001>
module attributes {stable_mosaic.version = 11 : i64} {
  func.func @_gtc_kernel(%arg0: i32, %arg1: memref<192x128xf32, #tpu.memory_space<vmem>>, %arg2: memref<2x16x64xf32, #tpu.memory_space<vmem>>, %arg3: memref<2x16x128xf32, #tpu.memory_space<vmem>>) attributes {dimension_semantics = [#tpu.dimension_semantics<parallel>], iteration_bounds = array<i64: 1>, scalar_prefetch = 0 : i64, scratch_operands = 0 : i64, tpu.core_type = #tpu.core_type<tc>, window_params = [{pipeline_mode = #tpu.pipeline_mode<synchronous>, transform_indices = @transform_0, window_bounds = array<i64: 192, 128>}, {transform_indices = @transform_1, window_bounds = array<i64: 2, 16, 64>}, {transform_indices = @transform_2, window_bounds = array<i64: 2, 16, 128>}]} {
    %c0 = arith.constant 0 : index
    %c0_0 = arith.constant 0 : index
    %c0_1 = arith.constant 0 : index
    %0 = vector.load %arg2[%c0, %c0_0, %c0_1] : memref<2x16x64xf32, #tpu.memory_space<vmem>>, vector<2x16x64xf32>
    %cst = arith.constant 0.000000e+00 : f32
    %1 = vector.broadcast %cst : f32 to vector<2x1x64xf32>
    %2 = vector.extract_strided_slice %0 {offsets = [0, 0, 0], sizes = [2, 15, 64], strides = [1, 1, 1]} : vector<2x16x64xf32> to vector<2x15x64xf32>
    %3 = tpu.concatenate %1, %2 in 1 : vector<2x1x64xf32>, vector<2x15x64xf32> -> vector<2x16x64xf32>
    %cst_2 = arith.constant 0.000000e+00 : f32
    %4 = vector.broadcast %cst_2 : f32 to vector<2x1x64xf32>
    %5 = vector.extract_strided_slice %0 {offsets = [0, 1, 0], sizes = [2, 15, 64], strides = [1, 1, 1]} : vector<2x16x64xf32> to vector<2x15x64xf32>
    %6 = tpu.concatenate %5, %4 in 1 : vector<2x15x64xf32>, vector<2x1x64xf32> -> vector<2x16x64xf32>
    %7 = tpu.concatenate %3, %0, %6 in 2 : vector<2x16x64xf32>, vector<2x16x64xf32>, vector<2x16x64xf32> -> vector<2x16x192xf32>
    %8 = vector.shape_cast %7 : vector<2x16x192xf32> to vector<32x192xf32>
    %c0_3 = arith.constant 0 : index
    %c0_4 = arith.constant 0 : index
    %9 = vector.load %arg1[%c0_3, %c0_4] : memref<192x128xf32, #tpu.memory_space<vmem>>, vector<192x128xf32>
    %cst_5 = arith.constant dense<0.000000e+00> : vector<32x128xf32>
    %10 = tpu.matmul %8, %9, %cst_5 {dimension_numbers = #tpu.dot_dimension_numbers<[1], [0], [0], [1], [0, 0, 1, 1], [], []>} : vector<32x192xf32>, vector<192x128xf32>, vector<32x128xf32> -> vector<32x128xf32>
    %11 = vector.shape_cast %10 : vector<32x128xf32> to vector<2x16x128xf32>
    %c0_6 = arith.constant 0 : index
    %c0_7 = arith.constant 0 : index
    %c0_8 = arith.constant 0 : index
    %12 = vector.load %arg3[%c0_6, %c0_7, %c0_8] : memref<2x16x128xf32, #tpu.memory_space<vmem>>, vector<2x16x128xf32>
    tpu.vector_store %arg3[%c0_6, %c0_7, %c0_8], %11 {strides = array<i32>} : memref<2x16x128xf32, #tpu.memory_space<vmem>>, vector<2x16x128xf32>,
    return
  }
  func.func @transform_0(%arg0: i32) -> (i32, i32) {
    %c0_i32 = arith.constant 0 : i32
    %c0_i32_0 = arith.constant 0 : i32
    %c0_i32_1 = arith.constant 0 : i32
    return %c0_i32, %c0_i32_0 : i32, i32
  }
  func.func @transform_1(%arg0: i32) -> (i32, i32, i32) {
    %c0_i32 = arith.constant 0 : i32
    %c0_i32_0 = arith.constant 0 : i32
    %c0_i32_1 = arith.constant 0 : i32
    return %arg0, %c0_i32, %c0_i32_0 : i32, i32, i32
  }
  func.func @transform_2(%arg0: i32) -> (i32, i32, i32) {
    %c0_i32 = arith.constant 0 : i32
    %c0_i32_0 = arith.constant 0 : i32
    %c0_i32_1 = arith.constant 0 : i32
    return %arg0, %c0_i32, %c0_i32_0 : i32, i32, i32
  }
}

</mosaic_0001>

<bundles_post_ra>
// kernel: tpu_custom_call.1
= control target key start
LH: loop header
LB: loop body
LE: loop exit
PB: predicated region body
PF: predicated region fallthrough
CT: control target
= control target key end

     0   :  { %7 = vsyncpa [#allocation3], 0  ;;  %s520_s0 = inlined_call_operand.hbm [shape: f32[192,128], index: 0, kind: input, shape index: {}]   ;;  %s521_s1 = inlined_call_operand.hbm [shape: f32[2,16,64], index: 1, kind: input, shape index: {}]   ;;  %s522_s2 = inlined_call_operand.hbm [shape: f32[2,16,128], index: 2, kind: output, shape index: {}]  }
   0x1   :  { %8 = vsyncpa [#allocation6], 0 }
   0x2   :  { %9 = vsyncpa [#allocation4], 0  ;;  %s383_s9 = smov [#allocation2]   ;;  %s311_s13 = scalar_lea.hbm %s520_s0, 3072 }
   0x3   :  { %s15_s10 = sshll.u32 %s383_s9, 4  ;;  %p312_p0 = scmp.ne.s32.totalorder %s520_s0, %s311_s13  ;;  %s16_s10 = int_to_ptr.vmem [resolvable:$true] %s15_s10 }
   0x4   :  { %p315_p1 = scmp.lt.u32.totalorder %s311_s13, %s520_s0 }
   0x6   :  { %p317_p2 = pnand %p315_p1, %p312_p0 }
   0x8   :  { %320 = shalt.err (!%p317_p2)
}
   0x9   :  { %s321_s18 = scalar_lea.vmem %s16_s10, 3072  ;;  %p326_p4 = scmp.lt.s32.totalorder %s16_s10, %s16_s10 }
   0xa   :  { %p322_p3 = scmp.ne.s32.totalorder %s16_s10, %s321_s18  ;;  %p327_p5 = scmp.lt.s32.totalorder %s321_s18, %s321_s18 }
   0xc   :  { %p328_p6 = por %p327_p5, %p326_p4 }
   0xe   :  { %p329_p7 = pnand %p328_p6, %p322_p3 }
  0x10   :  { %332 = shalt.err (!%p329_p7)
}
  0x11   :  { %s384_s19 = smov 128   ;;  %s385_s20 = smov 8  }
  0x12   :  { %21 = dma.hbm_to_vmem [thread:$0]  %s520_s0, 3072, %s16_s10, [#allocation3], %s384_s19, %s384_s19, %s385_s20  }
  0x13   :  { %s386_s23 = smov [#allocation5]   ;;  %s333_s27 = scalar_lea.hbm %s521_s1, 512 }
  0x14   :  { %s27_s24 = sshll.u32 %s386_s23, 4  ;;  %p334_p8 = scmp.ne.s32.totalorder %s521_s1, %s333_s27  ;;  %s28_s24 = int_to_ptr.vmem [resolvable:$true] %s27_s24 }
  0x15   :  { %p337_p9 = scmp.lt.u32.totalorder %s333_s27, %s521_s1 }
  0x17   :  { %p339_p10 = pnand %p337_p9, %p334_p8 }
  0x19   :  { %342 = shalt.err (!%p339_p10)
}
  0x1a   :  { %s343_s4 = scalar_lea.vmem %s28_s24, 512  ;;  %p348_p12 = scmp.lt.s32.totalorder %s28_s24, %s28_s24 }
  0x1b   :  { %p344_p11 = scmp.ne.s32.totalorder %s28_s24, %s343_s4  ;;  %p349_p13 = scmp.lt.s32.totalorder %s343_s4, %s343_s4 }
  0x1d   :  { %p350_p0 = por %p349_p13, %p348_p12 }
  0x1f   :  { %p351_p1 = pnand %p350_p0, %p344_p11 }
  0x21   :  { %354 = shalt.err (!%p351_p1)
}
  0x22   :  { %33 = dma.hbm_to_vmem [thread:$0]  %s521_s1, 512, %s28_s24, [#allocation6], %s384_s19, %s384_s19, %s385_s20  }
  0x23   :  { %377 = dma.done.wait [#allocation3], 3072  }
  0x24   :  { %378 = vsyncadd [#allocation3], 4294964224 }
  0x25   :  { %379 = dma.done.wait [#allocation6], 512  }
  0x26   :  { %380 = vsyncadd [#allocation6], 4294966784  ;;  %v387_v0 = vmov 0.0|0.0   ;;  %v437_v1 = vld [vmem:[#allocation5] sm:$0xff]  ;;  %v439_v2 = vld [vmem:[#allocation5 + $0x10] sm:$0xff]  ;;  %vm61_vm0 = vcmask 1046528  }
  0x27   :  { %234 = vmatprep.subr.bf16.mxu0 %v387_v0  ;;  %270 = vmatprep.subr.bf16.mxu1 %v387_v0  ;;  %v41_v3 = vld [vmem:[#allocation5 + $0x8] sm:$0xff]  ;;  %v301_v4 = vpack.i.bf16 %v439_v2, %v437_v1  ;;  %v43_v5 = vld [vmem:[#allocation5 + $0x18] sm:$0xff]  ;;  %v89_v6 = vld [vmem:[#allocation2] sm:$0xff]  ;;  %v62_v8 = vrot.slane %v437_v1, 1  ;;  %v65_v10 = vrot.slane %v439_v2, 1  ;;  %s388_s1 = smov 64  }
  0x28   :  { %v90_v7 = vld [vmem:[#allocation2 + $0x8] sm:$0xff]  ;;  %v63_v9 = vrot.slane %v41_v3, 1  ;;  %v91_v12 = vld [vmem:[#allocation2 + $0x10] sm:$0xff]  ;;  %v92_v13 = vld [vmem:[#allocation2 + $0x18] sm:$0xff]  ;;  %v66_v14 = vrot.slane %v43_v5, 1  ;;  %v306_v15 = vpack.i.bf16 %v43_v5, %v41_v3  ;;  %vm84_vm1 = vcmask 523264  }
  0x29   :  { %v235_v11 = vpack.c.bf16 %v90_v7, %v89_v6  ;;  %302 = vrot.lane.b32.xlu0 %v301_v4, %s388_s1  ;;  %v238_v18 = vpack.c.bf16 %v92_v13, %v91_v12  ;;  %v93_v20 = vld [vmem:[#allocation2 + $0x20] sm:$0xff]  ;;  %v94_v21 = vld [vmem:[#allocation2 + $0x28] sm:$0xff]  ;;  %v49_v22 = vrot.slane %v437_v1, 7  ;;  %v50_v24 = vrot.slane %v41_v3, 7  ;;  %v95_v30 = vld [vmem:[#allocation2 + $0x30] sm:$0xff]  ;;  %s389_s6 = smov [#allocation7]  }
  0x2a   :  { %v64_v16 = vsel %vm61_vm0, %v62_v8, %v63_v9  ;;  %v447_v17 = vsel %vm61_vm0, %v63_v9, 0.0  ;;  %v67_v19 = vsel %vm61_vm0, %v65_v10, %v66_v14  ;;  %v454_v23 = vsel %vm61_vm0, %v66_v14, 0.0  ;;  %v96_v31 = vld [vmem:[#allocation2 + $0x38] sm:$0xff]  ;;  %v97_v33 = vld [vmem:[#allocation2 + $0x40] sm:$0xff]  ;;  %v98_v34 = vld [vmem:[#allocation2 + $0x48] sm:$0xff]  ;;  %s217_s7 = sshll.u32 %s389_s6, 4  ;;  %s218_s7 = int_to_ptr.vmem [resolvable:$true] %s217_s7 }
  0x2b   :  { %236 = vmatpush1.bf16.msra.mxu0 %v235_v11  ;;  %282 = vmatpush1.bf16.msra.mxu1 %v235_v11  ;;  %vm48_vm2 = vcmask 1040384   ;;  %v52_v25 = vrot.slane %v439_v2, 7  ;;  %v53_v26 = vrot.slane %v43_v5, 7  ;;  %v241_v28 = vpack.c.bf16 %v94_v21, %v93_v20  ;;  %v99_v36 = vld [vmem:[#allocation2 + $0x50] sm:$0xff]  ;;  %v100_v37 = vld [vmem:[#allocation2 + $0x58] sm:$0xff]  ;;  %v101_v39 = vld [vmem:[#allocation2 + $0x60] sm:$0xff]  ;;  %p360_p3 = scmp.lt.s32.totalorder %s218_s7, %s218_s7 }
  0x2c   :  { %237 = vmatprep.subr.bf16.mxu0 %v387_v0  ;;  %271 = vmatprep.subr.bf16.mxu1 %v387_v0  ;;  %v462_v27 = vsel %vm48_vm2, %v49_v22, %v50_v24  ;;  %v244_v32 = vpack.c.bf16 %v96_v31, %v95_v30  ;;  %v247_v35 = vpack.c.bf16 %v98_v34, %v97_v33  ;;  %v102_v40 = vld [vmem:[#allocation2 + $0x68] sm:$0xff]  ;;  %v103_v42 = vld [vmem:[#allocation2 + $0x70] sm:$0xff]  ;;  %v104_v43 = vld [vmem:[#allocation2 + $0x78] sm:$0xff]  ;;  %v59_v58 = vsel %vm48_vm2, 0.0, %v49_v22  ;;  %s355_s8 = scalar_lea.vmem %s218_s7, 512 }
  0x2d   :  { %230 = vmatprep.mubr.msk.f32.mxu0 %vm84_vm1, %v64_v16  ;;  %232 = vmatprep.mubr.msk.f32.mxu1 %vm84_vm1, %v67_v19  ;;  %v467_v29 = vsel %vm48_vm2, %v52_v25, %v53_v26  ;;  %v250_v38 = vpack.c.bf16 %v100_v37, %v99_v36  ;;  %v253_v41 = vpack.c.bf16 %v102_v40, %v101_v39  ;;  %v105_v45 = vld [vmem:[#allocation2 + $0x80] sm:$0xff]  ;;  %v106_v46 = vld [vmem:[#allocation2 + $0x88] sm:$0xff]  ;;  %v107_v48 = vld [vmem:[#allocation2 + $0x90] sm:$0xff]  ;;  %v60_v59 = vsel %vm48_vm2, 0.0, %v52_v25  ;;  %p356_p2 = scmp.ne.s32.totalorder %s218_s7, %s355_s8  ;;  %p361_p4 = scmp.lt.s32.totalorder %s355_s8, %s355_s8 }
  0x2e   :  { %307 = vrot.lane.b32.xlu0 %v306_v15, %s388_s1  ;;  %v256_v44 = vpack.c.bf16 %v104_v43, %v103_v42  ;;  %v259_v47 = vpack.c.bf16 %v106_v46, %v105_v45  ;;  %v108_v49 = vld [vmem:[#allocation2 + $0x98] sm:$0xff]  ;;  %v109_v51 = vld [vmem:[#allocation2 + $0xa0] sm:$0xff]  ;;  %v110_v52 = vld [vmem:[#allocation2 + $0xa8] sm:$0xff] }
  0x2f   :  { %239 = vmatpush1.bf16.msra.mxu0 %v238_v18  ;;  %283 = vmatpush1.bf16.msra.mxu1 %v238_v18  ;;  %v262_v50 = vpack.c.bf16 %v108_v49, %v107_v48  ;;  %v265_v53 = vpack.c.bf16 %v110_v52, %v109_v51  ;;  %v111_v54 = vld [vmem:[#allocation2 + $0xb0] sm:$0xff]  ;;  %v112_v55 = vld [vmem:[#allocation2 + $0xb8] sm:$0xff]  ;;  %p362_p5 = por %p361_p4, %p360_p3 }
  0x30   :  { %240 = vmatprep.subr.bf16.mxu0 %v387_v0  ;;  %272 = vmatprep.subr.bf16.mxu1 %v387_v0  ;;  %v268_v56 = vpack.c.bf16 %v112_v55, %v111_v54 }
  0x31   :  { %p363_p6 = pnand %p362_p5, %p356_p2 }
  0x33   :  { %242 = vmatpush1.bf16.msra.mxu0 %v241_v28  ;;  %284 = vmatpush1.bf16.msra.mxu1 %v241_v28 }
  0x34   :  { %243 = vmatprep.subr.bf16.mxu0 %v387_v0  ;;  %273 = vmatprep.subr.bf16.mxu1 %v387_v0 }
  0x37   :  { %245 = vmatpush1.bf16.msra.mxu0 %v244_v32  ;;  %285 = vmatpush1.bf16.msra.mxu1 %v244_v32 }
  0x38   :  { %246 = vmatprep.subr.bf16.mxu0 %v387_v0  ;;  %274 = vmatprep.subr.bf16.mxu1 %v387_v0 }
  0x3b   :  { %248 = vmatpush1.bf16.msra.mxu0 %v247_v35  ;;  %286 = vmatpush1.bf16.msra.mxu1 %v247_v35 }
  0x3c   :  { %249 = vmatprep.subr.bf16.mxu0 %v387_v0  ;;  %275 = vmatprep.subr.bf16.mxu1 %v387_v0 }
  0x3f   :  { %251 = vmatpush1.bf16.msra.mxu0 %v250_v38  ;;  %287 = vmatpush1.bf16.msra.mxu1 %v250_v38 }
  0x40   :  { %252 = vmatprep.subr.bf16.mxu0 %v387_v0  ;;  %276 = vmatprep.subr.bf16.mxu1 %v387_v0 }
  0x43   :  { %254 = vmatpush1.bf16.msra.mxu0 %v253_v41  ;;  %288 = vmatpush1.bf16.msra.mxu1 %v253_v41 }
  0x44   :  { %255 = vmatprep.subr.bf16.mxu0 %v387_v0  ;;  %277 = vmatprep.subr.bf16.mxu1 %v387_v0 }
  0x47   :  { %257 = vmatpush1.bf16.msra.mxu0 %v256_v44  ;;  %289 = vmatpush1.bf16.msra.mxu1 %v256_v44 }
  0x48   :  { %258 = vmatprep.subr.bf16.mxu0 %v387_v0  ;;  %278 = vmatprep.subr.bf16.mxu1 %v387_v0 }
  0x4b   :  { %260 = vmatpush1.bf16.msra.mxu0 %v259_v47  ;;  %290 = vmatpush1.bf16.msra.mxu1 %v259_v47 }
  0x4c   :  { %261 = vmatprep.subr.bf16.mxu0 %v387_v0  ;;  %279 = vmatprep.subr.bf16.mxu1 %v387_v0 }
  0x4f   :  { %263 = vmatpush1.bf16.msra.mxu0 %v262_v50  ;;  %291 = vmatpush1.bf16.msra.mxu1 %v262_v50 }
  0x50   :  { %264 = vmatprep.subr.bf16.mxu0 %v387_v0  ;;  %280 = vmatprep.subr.bf16.mxu1 %v387_v0 }
  0x53   :  { %266 = vmatpush1.bf16.msra.mxu0 %v265_v53  ;;  %292 = vmatpush1.bf16.msra.mxu1 %v265_v53 }
  0x54   :  { %267 = vmatprep.subr.bf16.mxu0 %v387_v0  ;;  %281 = vmatprep.subr.bf16.mxu1 %v387_v0 }
  0x57   :  { %269 = vmatpush1.bf16.msra.mxu0 %v268_v56  ;;  %293 = vmatpush1.bf16.msra.mxu1 %v268_v56 }
  0x9b   :  { %v303_v57 = vpop.permute.xlu0 %302 }
  0x9c   :  { %v305_v60 = vunpack.i.h.bf16 %v303_v57  ;;  %v304_v61 = vunpack.i.l.bf16 %v303_v57 }
  0x9e   :  { %v85_v62 = vsel %vm84_vm1, %v59_v58, %v304_v61  ;;  %v87_v63 = vsel %vm84_vm1, %v60_v59, %v305_v60 }
  0x9f   :  { %188 = vmatmul.mubr.f32.vlgmr.msra.gmra.mrb[0].mxu0 %v85_v62  ;;  %198 = vmatmul.mubr.f32.vlgmr.msra.gmra.mrb[0].mxu1 %v87_v63 }
  0xa0   :  { %v308_v3 = vpop.permute.xlu0 %307  ;;  %231 = vmatprep.mubr.msk.f32.mxu0 %vm84_vm1, %v447_v17  ;;  %233 = vmatprep.mubr.msk.f32.mxu1 %vm84_vm1, %v454_v23 }
  0xa1   :  { %v310_v0 = vunpack.i.h.bf16 %v308_v3  ;;  %v309_v4 = vunpack.i.l.bf16 %v308_v3 }
  0xa3   :  { %v86_v1 = vsel %vm84_vm1, %v462_v27, %v309_v4  ;;  %v88_v2 = vsel %vm84_vm1, %v467_v29, %v310_v0 }
  0xa4   :  { %193 = vmatmul.mubr.f32.gmra.mrb[2].mxu0 %v86_v1  ;;  %203 = vmatmul.mubr.f32.gmra.mrb[2].mxu1 %v88_v2 }
 0x172   :  { %v189_v5 = vpop.f32.mrb[0].mxu0  ;;  %v199_v6 = vpop.f32.mrb[0].mxu1 }
 0x173   :  { %208 = vst [vmem:[#allocation7] sm:$0xff] %v189_v5  ;;  %210 = vst [vmem:[#allocation7 + $0x10] sm:$0xff] %v199_v6  ;;  %v191_v7 = vpop.f32.mrb[1].mxu0  ;;  %v201_v8 = vpop.f32.mrb[1].mxu1 }
 0x177   :  { %v194_v9 = vpop.f32.mrb[2].mxu0  ;;  %v204_v10 = vpop.f32.mrb[2].mxu1 }
 0x178   :  { %209 = vst [vmem:[#allocation7 + $0x8] sm:$0xff] %v194_v9  ;;  %211 = vst [vmem:[#allocation7 + $0x18] sm:$0xff] %v204_v10  ;;  %v196_v11 = vpop.f32.mrb[3].mxu0  ;;  %v206_v12 = vpop.f32.mrb[3].mxu1 }
 0x179   :  { %366 = shalt.err (!%p363_p6)
}
 0x17a   :  { %s367_s11 = scalar_lea.hbm %s522_s2, 512 }
 0x17b   :  { %p368_p7 = scmp.ne.s32.totalorder %s522_s2, %s367_s11  ;;  %p371_p8 = scmp.lt.u32.totalorder %s367_s11, %s522_s2 }
 0x17d   :  { %p373_p9 = pnand %p371_p8, %p368_p7 }
 0x17f   :  { %376 = shalt.err (!%p373_p9)
}
 0x180   :  { %223 = dma.vmem_to_hbm [thread:$0]  %s218_s7, 512, %s522_s2, [#allocation4], %s384_s19, %s384_s19, %s385_s20  }
 0x181   :  { %381 = dma.done.wait [#allocation4], 512  }
 0x182   :  { %382 = vsyncadd [#allocation4], 4294966784 }
 0x183   :  { %227 = vsyncpa [#allocation3], 1 }
 0x184   :  { %228 = vsyncpa [#allocation6], 1 }
 0x185   :  { %229 = vsyncpa [#allocation4], 1 }

</bundles_post_ra>
